<compile_context>
chip_gen: v7x
topology: tpu7x:2x2x1
jax: 0.10.0
libtpu: 0.0.40
codegen_flags: <defaults>
</compile_context>

<pallas_src>
import functools

import jax
import jax.numpy as jnp
from jax.experimental import pallas as pl
from jax.experimental.pallas import tpu as pltpu

STATE_LANES = 128  # running extreme-value state padded to one full lane group


def chowder_kernel(x_ref, w1_ref, bias_ref, w2_ref, o_ref,
                   top_state, bot_state, *, n_top, n_bottom):
    n_idx = pl.program_id(1)
    n_last = pl.num_programs(1) - 1
    n_feat = w1_ref.shape[0]

    # Reset running top/bottom state at the start of every batch element.
    @pl.when(n_idx == 0)
    def _():
        top_state[...] = jnp.full_like(top_state, -jnp.inf)
        bot_state[...] = jnp.full_like(bot_state, jnp.inf)

    # Tile scores straight out of the MXU, N on the lane axis:
    # (F, D) bf16 @ (D, Nt) bf16 -> (F, Nt) f32.  b1 is folded into bias_ref.
    scores = jnp.dot(w1_ref[...], x_ref[0], preferred_element_type=jnp.float32)

    # Candidates = [running state (128 lanes, padded with +/-inf) | new scores].
    # Concat sits on a 128-lane boundary -> no lane shift of the score tile.
    top_cand = jnp.concatenate([top_state[...], scores], axis=-1)
    bot_cand = jnp.concatenate([bot_state[...], scores], axis=-1)
    width = top_cand.shape[-1]
    ids = jax.lax.broadcasted_iota(jnp.int32, top_cand.shape, 1)

    def select(work, k_count, find_max):
        # Iteratively pick k_count extremes; mask only the FIRST occurrence per
        # pick so tie multiplicity matches torch.topk.
        vals = []
        for _ in range(k_count):
            if find_max:
                m = jnp.max(work, axis=-1, keepdims=True)
                fill = -jnp.inf
            else:
                m = jnp.min(work, axis=-1, keepdims=True)
                fill = jnp.inf
            first = jnp.min(jnp.where(work == m, ids, width),
                            axis=-1, keepdims=True)
            work = jnp.where(ids == first, fill, work)
            vals.append(m)
        return jnp.concatenate(vals, axis=-1)                  # (F, k_count)

    new_top = select(top_cand, n_top, find_max=True)           # descending
    new_bot = select(bot_cand, n_bottom, find_max=False)       # ascending

    # Persist running state (lanes >= k stay at +/-inf from the init).
    top_state[:, 0:n_top] = new_top
    bot_state[:, 0:n_bottom] = new_bot

    # Final Linear(K -> 1), folded into the epilogue on the last N step.
    @pl.when(n_idx == n_last)
    def _():
        acc = jnp.zeros((n_feat, 1), jnp.float32)
        for k in range(n_top):
            acc = acc + w2_ref[k] * new_top[:, k:k + 1]
        for k in range(n_bottom):
            acc = acc + w2_ref[n_top + k] * new_bot[:, k:k + 1]
        # bias_ref holds b1 * sum(w2) + b2 (valid post-selection fold).
        o_ref[0] = acc.reshape(1, n_feat) + bias_ref[...]


def chowder_forward_bdn(x_bdn, w1, b1, w2, b2, *, n_top, n_bottom, n_block=None):
    """Core entry point.

    x_bdn: (B, D, N) features, N on the minor axis (bf16 recommended end-to-end).
    w1: (F, D); b1: (F,); w2: (1, K) or (K,); b2: (1,) or scalar.  Returns (B, F) f32.
    """
    B, D, N = x_bdn.shape
    F = w1.shape[0]
    K = n_top + n_bottom
    assert n_top <= STATE_LANES and n_bottom <= STATE_LANES

    if n_block is None:
        n_block = next((t for t in (512, 256, 128) if N % t == 0), N)
    assert N % n_block == 0, "n_block must divide N_TILES"

    x_bdn = x_bdn.astype(jnp.bfloat16)
    w1_bf = jnp.asarray(w1, jnp.bfloat16)                      # (F, D)
    w2_flat = jnp.asarray(w2, jnp.float32).reshape(K)          # SMEM scalars
    # Fold b1 (per-feature constant, cannot change selection) + b2 into one bias.
    bias_out = (jnp.asarray(b1, jnp.float32) * jnp.sum(w2_flat)
                + jnp.asarray(b2, jnp.float32).reshape(())).reshape(1, F)

    # VMEM budget: double-buffered bf16 feature block + weights/scratch headroom.
    block_bytes = D * n_block * 2
    vmem_limit = int(min(max(6 * block_bytes + (4 << 20), 16 << 20), 48 << 20))

    kernel = functools.partial(chowder_kernel, n_top=n_top, n_bottom=n_bottom)
    out = pl.pallas_call(
        kernel,
        out_shape=jax.ShapeDtypeStruct((B, 1, F), jnp.float32),
        grid=(B, N // n_block),
        in_specs=[
            pl.BlockSpec((1, D, n_block), lambda b, n: (b, 0, n)),
            pl.BlockSpec((F, D), lambda b, n: (0, 0)),
            pl.BlockSpec((1, F), lambda b, n: (0, 0)),
            pl.BlockSpec(memory_space=pltpu.MemorySpace.SMEM),
        ],
        out_specs=pl.BlockSpec((1, 1, F), lambda b, n: (b, 0, 0)),
        scratch_shapes=[
            pltpu.VMEM((F, STATE_LANES), jnp.float32),   # running top-k (sorted desc)
            pltpu.VMEM((F, STATE_LANES), jnp.float32),   # running bottom-k (sorted asc)
        ],
        compiler_params=pltpu.CompilerParams(
            dimension_semantics=("parallel", "arbitrary"),
            vmem_limit_bytes=vmem_limit,
        ),
    )(x_bdn, w1_bf, bias_out, w2_flat)
    return out.reshape(B, F)


def chowder_forward(features, w1, b1, w2, b2, *, n_top, n_bottom, n_block=None):
    """Convenience wrapper taking features in the natural (B, N, D) layout.

    Does a single fused transpose+cast to the (B, D, N) bf16 layout the kernel
    streams.  In production, produce that layout upstream and call
    chowder_forward_bdn directly to avoid this extra HBM pass.
    """
    x_bdn = jnp.swapaxes(features, 1, 2).astype(jnp.bfloat16)
    return chowder_forward_bdn(x_bdn, w1, b1, w2, b2,
                               n_top=n_top, n_bottom=n_bottom, n_block=n_block)


def chowder_reference(features, w1, b1, w2, b2, *, n_top, n_bottom):
    """Pure-JAX reference mirroring the PyTorch forward (mask=None), in f32."""
    scores = jnp.einsum("bnd,fd->bnf", features, w1) + b1          # (B, N, F)
    s_t = jnp.swapaxes(scores, 1, 2)                               # (B, F, N)
    top_vals, _ = jax.lax.top_k(s_t, n_top)                        # descending
    bot_vals = -jax.lax.top_k(-s_t, n_bottom)[0]                   # ascending
    extreme = jnp.concatenate([top_vals, bot_vals], axis=2)        # (B, F, K)
    logits = jnp.einsum("bfk,k->bf", extreme, w2.reshape(-1)) + b2.reshape(())
    return logits


def xavier_uniform(key, shape):
    fan_out, fan_in = shape
    bound = (6.0 / (fan_in + fan_out)) ** 0.5
    return jax.random.uniform(key, shape, jnp.float32, -bound, bound)


if __name__ == "__main__":
    B, N_TILES, IN_FEATURES, OUT_FEATURES = 2, 32, 32, 4
    N_TOP, N_BOTTOM = 5, 5
    K = N_TOP + N_BOTTOM

    key = jax.random.PRNGKey(0)
    k_feat, k_w1, k_b1, k_w2, k_b2, k_feat2 = jax.random.split(key, 6)

    features = jax.random.normal(k_feat, (B, N_TILES, IN_FEATURES), jnp.float32)

    # score_model: Linear(D -> F); mlp: Linear(K -> 1).  Biases made non-zero to
    # exercise the b1/b2 epilogue fold (Chowder init would set them to 0).
    w1 = xavier_uniform(k_w1, (OUT_FEATURES, IN_FEATURES))
    b1 = 0.1 * jax.random.normal(k_b1, (OUT_FEATURES,), jnp.float32)
    w2 = xavier_uniform(k_w2, (1, K))
    b2 = 0.1 * jax.random.normal(k_b2, (1,), jnp.float32)

    # Reference uses the same bf16-rounded operands the kernel feeds to the MXU.
    w1_rt = w1.astype(jnp.bfloat16).astype(jnp.float32)

    # --- Test 1: small shapes, single N step -------------------------------
    logits = chowder_forward(features, w1, b1, w2, b2, n_top=N_TOP, n_bottom=N_BOTTOM)
    logits = jax.block_until_ready(logits)
    feat_rt = features.astype(jnp.bfloat16).astype(jnp.float32)
    ref = chowder_reference(feat_rt, w1_rt, b1, w2, b2, n_top=N_TOP, n_bottom=N_BOTTOM)
    assert logits.shape == (B, OUT_FEATURES), logits.shape
    assert jnp.allclose(logits, ref, atol=1e-3, rtol=1e-3), (logits, ref)

    # --- Test 2: exercise the streamed ("arbitrary") N axis: 2 blocks of 128 --
    N2 = 256
    features2 = jax.random.normal(k_feat2, (B, N2, IN_FEATURES), jnp.float32)
    logits2 = chowder_forward(features2, w1, b1, w2, b2,
                              n_top=N_TOP, n_bottom=N_BOTTOM, n_block=128)
    logits2 = jax.block_until_ready(logits2)
    feat2_rt = features2.astype(jnp.bfloat16).astype(jnp.float32)
    ref2 = chowder_reference(feat2_rt, w1_rt, b1, w2, b2, n_top=N_TOP, n_bottom=N_BOTTOM)
    assert logits2.shape == (B, OUT_FEATURES), logits2.shape
    assert jnp.allclose(logits2, ref2, atol=1e-3, rtol=1e-3), (logits2, ref2)

    print("KERNEL_OK")
</pallas_src>

<mosaic_0001>
module attributes {stable_mosaic.version = 11 : i64} {
  func.func @chowder_kernel(%arg0: i32, %arg1: i32, %arg2: memref<1x32x32xbf16, #tpu.memory_space<vmem>>, %arg3: memref<4x32xbf16, #tpu.memory_space<vmem>>, %arg4: memref<1x4xf32, #tpu.memory_space<vmem>>, %arg5: memref<10xf32, #tpu.memory_space<smem>>, %arg6: memref<1x1x4xf32, #tpu.memory_space<vmem>>, %arg7: memref<4x128xf32, #tpu.memory_space<vmem>>, %arg8: memref<4x128xf32, #tpu.memory_space<vmem>>) attributes {dimension_semantics = [#tpu.dimension_semantics<parallel>, #tpu.dimension_semantics<arbitrary>], iteration_bounds = array<i64: 2, 1>, scalar_prefetch = 0 : i64, scratch_operands = 2 : i64, tpu.core_type = #tpu.core_type<tc>, window_params = [{transform_indices = @transform_0, window_bounds = array<i64: 1, 32, 32>}, {pipeline_mode = #tpu.pipeline_mode<synchronous>, transform_indices = @transform_1, window_bounds = array<i64: 4, 32>}, {pipeline_mode = #tpu.pipeline_mode<synchronous>, transform_indices = @transform_2, window_bounds = array<i64: 1, 4>}, {transform_indices = @transform_3, window_bounds = array<i64: 10>}, {transform_indices = @transform_4, window_bounds = array<i64: 1, 1, 4>}]} {
    %c0_i32 = arith.constant 0 : i32
    %0 = arith.cmpi eq, %arg1, %c0_i32 : i32
    %1 = arith.extui %0 : i1 to i32
    %c0_i32_0 = arith.constant 0 : i32
    %2 = arith.cmpi ne, %1, %c0_i32_0 : i32
    scf.if %2 {
      %cst_48 = arith.constant 0xFF800000 : f32
      %119 = vector.broadcast %cst_48 : f32 to vector<4x128xf32>
      %c0_49 = arith.constant 0 : index
      %c0_50 = arith.constant 0 : index
      %120 = vector.load %arg7[%c0_49, %c0_50] : memref<4x128xf32, #tpu.memory_space<vmem>>, vector<4x128xf32>
      tpu.vector_store %arg7[%c0_49, %c0_50], %119 {strides = array<i32>} : memref<4x128xf32, #tpu.memory_space<vmem>>, vector<4x128xf32>,
      %cst_51 = arith.constant 0x7F800000 : f32
      %121 = vector.broadcast %cst_51 : f32 to vector<4x128xf32>
      %c0_52 = arith.constant 0 : index
      %c0_53 = arith.constant 0 : index
      %122 = vector.load %arg8[%c0_52, %c0_53] : memref<4x128xf32, #tpu.memory_space<vmem>>, vector<4x128xf32>
      tpu.vector_store %arg8[%c0_52, %c0_53], %121 {strides = array<i32>} : memref<4x128xf32, #tpu.memory_space<vmem>>, vector<4x128xf32>,
    } else {
    }
    %c0 = arith.constant 0 : index
    %c0_1 = arith.constant 0 : index
    %3 = vector.load %arg3[%c0, %c0_1] : memref<4x32xbf16, #tpu.memory_space<vmem>>, vector<4x32xbf16>
    %c0_2 = arith.constant 0 : index
    %c0_3 = arith.constant 0 : index
    %c0_4 = arith.constant 0 : index
    %4 = vector.load %arg2[%c0_2, %c0_3, %c0_4] : memref<1x32x32xbf16, #tpu.memory_space<vmem>>, vector<1x32x32xbf16>
    %5 = vector.shape_cast %4 : vector<1x32x32xbf16> to vector<32x32xbf16>
    %cst = arith.constant dense<0.000000e+00> : vector<4x32xf32>
    %6 = tpu.matmul %3, %5, %cst {dimension_numbers = #tpu.dot_dimension_numbers<[1], [0], [0], [1], [0, 0, 1, 1], [], []>} : vector<4x32xbf16>, vector<32x32xbf16>, vector<4x32xf32> -> vector<4x32xf32>
    %c0_5 = arith.constant 0 : index
    %c0_6 = arith.constant 0 : index
    %7 = vector.load %arg7[%c0_5, %c0_6] : memref<4x128xf32, #tpu.memory_space<vmem>>, vector<4x128xf32>
    %8 = tpu.concatenate %7, %6 in 1 : vector<4x128xf32>, vector<4x32xf32> -> vector<4x160xf32>
    %c0_7 = arith.constant 0 : index
    %c0_8 = arith.constant 0 : index
    %9 = vector.load %arg8[%c0_7, %c0_8] : memref<4x128xf32, #tpu.memory_space<vmem>>, vector<4x128xf32>
    %10 = tpu.concatenate %9, %6 in 1 : vector<4x128xf32>, vector<4x32xf32> -> vector<4x160xf32>
    %11 = tpu.iota {dimensions = array<i32: 1>} : vector<4x160xi32>
    %cst_9 = arith.constant dense<0xFF800000> : vector<4xf32>
    %12 = vector.multi_reduction <maximumf>, %8, %cst_9 [1] : vector<4x160xf32> to vector<4xf32>
    %13 = vector.shape_cast %12 : vector<4xf32> to vector<4x1xf32>
    %14 = vector.broadcast %13 : vector<4x1xf32> to vector<4x160xf32>
    %15 = arith.cmpf oeq, %8, %14 : vector<4x160xf32>
    %c160_i32 = arith.constant 160 : i32
    %16 = vector.broadcast %c160_i32 : i32 to vector<4x160xi32>
    %17 = arith.select %15, %11, %16 : vector<4x160xi1>, vector<4x160xi32>
    %cst_10 = arith.constant dense<2147483647> : vector<4xi32>
    %18 = vector.multi_reduction <minsi>, %17, %cst_10 [1] : vector<4x160xi32> to vector<4xi32>
    %19 = vector.shape_cast %18 : vector<4xi32> to vector<4x1xi32>
    %20 = vector.broadcast %19 : vector<4x1xi32> to vector<4x160xi32>
    %21 = arith.cmpi eq, %11, %20 : vector<4x160xi32>
    %cst_11 = arith.constant 0xFF800000 : f32
    %22 = vector.broadcast %cst_11 : f32 to vector<4x160xf32>
    %23 = arith.select %21, %22, %8 : vector<4x160xi1>, vector<4x160xf32>
    %cst_12 = arith.constant dense<0xFF800000> : vector<4xf32>
    %24 = vector.multi_reduction <maximumf>, %23, %cst_12 [1] : vector<4x160xf32> to vector<4xf32>
    %25 = vector.shape_cast %24 : vector<4xf32> to vector<4x1xf32>
    %26 = vector.broadcast %25 : vector<4x1xf32> to vector<4x160xf32>
    %27 = arith.cmpf oeq, %23, %26 : vector<4x160xf32>
    %c160_i32_13 = arith.constant 160 : i32
    %28 = vector.broadcast %c160_i32_13 : i32 to vector<4x160xi32>
    %29 = arith.select %27, %11, %28 : vector<4x160xi1>, vector<4x160xi32>
    %cst_14 = arith.constant dense<2147483647> : vector<4xi32>
    %30 = vector.multi_reduction <minsi>, %29, %cst_14 [1] : vector<4x160xi32> to vector<4xi32>
    %31 = vector.shape_cast %30 : vector<4xi32> to vector<4x1xi32>
    %32 = vector.broadcast %31 : vector<4x1xi32> to vector<4x160xi32>
    %33 = arith.cmpi eq, %11, %32 : vector<4x160xi32>
    %cst_15 = arith.constant 0xFF800000 : f32
    %34 = vector.broadcast %cst_15 : f32 to vector<4x160xf32>
    %35 = arith.select %33, %34, %23 : vector<4x160xi1>, vector<4x160xf32>
    %cst_16 = arith.constant dense<0xFF800000> : vector<4xf32>
    %36 = vector.multi_reduction <maximumf>, %35, %cst_16 [1] : vector<4x160xf32> to vector<4xf32>
    %37 = vector.shape_cast %36 : vector<4xf32> to vector<4x1xf32>
    %38 = vector.broadcast %37 : vector<4x1xf32> to vector<4x160xf32>
    %39 = arith.cmpf oeq, %35, %38 : vector<4x160xf32>
    %c160_i32_17 = arith.constant 160 : i32
    %40 = vector.broadcast %c160_i32_17 : i32 to vector<4x160xi32>
    %41 = arith.select %39, %11, %40 : vector<4x160xi1>, vector<4x160xi32>
    %cst_18 = arith.constant dense<2147483647> : vector<4xi32>
    %42 = vector.multi_reduction <minsi>, %41, %cst_18 [1] : vector<4x160xi32> to vector<4xi32>
    %43 = vector.shape_cast %42 : vector<4xi32> to vector<4x1xi32>
    %44 = vector.broadcast %43 : vector<4x1xi32> to vector<4x160xi32>
    %45 = arith.cmpi eq, %11, %44 : vector<4x160xi32>
    %cst_19 = arith.constant 0xFF800000 : f32
    %46 = vector.broadcast %cst_19 : f32 to vector<4x160xf32>
    %47 = arith.select %45, %46, %35 : vector<4x160xi1>, vector<4x160xf32>
    %cst_20 = arith.constant dense<0xFF800000> : vector<4xf32>
    %48 = vector.multi_reduction <maximumf>, %47, %cst_20 [1] : vector<4x160xf32> to vector<4xf32>
    %49 = vector.shape_cast %48 : vector<4xf32> to vector<4x1xf32>
    %50 = vector.broadcast %49 : vector<4x1xf32> to vector<4x160xf32>
    %51 = arith.cmpf oeq, %47, %50 : vector<4x160xf32>
    %c160_i32_21 = arith.constant 160 : i32
    %52 = vector.broadcast %c160_i32_21 : i32 to vector<4x160xi32>
    %53 = arith.select %51, %11, %52 : vector<4x160xi1>, vector<4x160xi32>
    %cst_22 = arith.constant dense<2147483647> : vector<4xi32>
    %54 = vector.multi_reduction <minsi>, %53, %cst_22 [1] : vector<4x160xi32> to vector<4xi32>
    %55 = vector.shape_cast %54 : vector<4xi32> to vector<4x1xi32>
    %56 = vector.broadcast %55 : vector<4x1xi32> to vector<4x160xi32>
    %57 = arith.cmpi eq, %11, %56 : vector<4x160xi32>
    %cst_23 = arith.constant 0xFF800000 : f32
    %58 = vector.broadcast %cst_23 : f32 to vector<4x160xf32>
    %59 = arith.select %57, %58, %47 : vector<4x160xi1>, vector<4x160xf32>
    %cst_24 = arith.constant dense<0xFF800000> : vector<4xf32>
    %60 = vector.multi_reduction <maximumf>, %59, %cst_24 [1] : vector<4x160xf32> to vector<4xf32>
    %61 = vector.shape_cast %60 : vector<4xf32> to vector<4x1xf32>
    %62 = tpu.concatenate %13, %25, %37, %49, %61 in 1 : vector<4x1xf32>, vector<4x1xf32>, vector<4x1xf32>, vector<4x1xf32>, vector<4x1xf32> -> vector<4x5xf32>
    %cst_25 = arith.constant dense<0x7F800000> : vector<4xf32>
    %63 = vector.multi_reduction <minimumf>, %10, %cst_25 [1] : vector<4x160xf32> to vector<4xf32>
    %64 = vector.shape_cast %63 : vector<4xf32> to vector<4x1xf32>
    %65 = vector.broadcast %64 : vector<4x1xf32> to vector<4x160xf32>
    %66 = arith.cmpf oeq, %10, %65 : vector<4x160xf32>
    %c160_i32_26 = arith.constant 160 : i32
    %67 = vector.broadcast %c160_i32_26 : i32 to vector<4x160xi32>
    %68 = arith.select %66, %11, %67 : vector<4x160xi1>, vector<4x160xi32>
    %cst_27 = arith.constant dense<2147483647> : vector<4xi32>
    %69 = vector.multi_reduction <minsi>, %68, %cst_27 [1] : vector<4x160xi32> to vector<4xi32>
    %70 = vector.shape_cast %69 : vector<4xi32> to vector<4x1xi32>
    %71 = vector.broadcast %70 : vector<4x1xi32> to vector<4x160xi32>
    %72 = arith.cmpi eq, %11, %71 : vector<4x160xi32>
    %cst_28 = arith.constant 0x7F800000 : f32
    %73 = vector.broadcast %cst_28 : f32 to vector<4x160xf32>
    %74 = arith.select %72, %73, %10 : vector<4x160xi1>, vector<4x160xf32>
    %cst_29 = arith.constant dense<0x7F800000> : vector<4xf32>
    %75 = vector.multi_reduction <minimumf>, %74, %cst_29 [1] : vector<4x160xf32> to vector<4xf32>
    %76 = vector.shape_cast %75 : vector<4xf32> to vector<4x1xf32>
    %77 = vector.broadcast %76 : vector<4x1xf32> to vector<4x160xf32>
    %78 = arith.cmpf oeq, %74, %77 : vector<4x160xf32>
    %c160_i32_30 = arith.constant 160 : i32
    %79 = vector.broadcast %c160_i32_30 : i32 to vector<4x160xi32>
    %80 = arith.select %78, %11, %79 : vector<4x160xi1>, vector<4x160xi32>
    %cst_31 = arith.constant dense<2147483647> : vector<4xi32>
    %81 = vector.multi_reduction <minsi>, %80, %cst_31 [1] : vector<4x160xi32> to vector<4xi32>
    %82 = vector.shape_cast %81 : vector<4xi32> to vector<4x1xi32>
    %83 = vector.broadcast %82 : vector<4x1xi32> to vector<4x160xi32>
    %84 = arith.cmpi eq, %11, %83 : vector<4x160xi32>
    %cst_32 = arith.constant 0x7F800000 : f32
    %85 = vector.broadcast %cst_32 : f32 to vector<4x160xf32>
    %86 = arith.select %84, %85, %74 : vector<4x160xi1>, vector<4x160xf32>
    %cst_33 = arith.constant dense<0x7F800000> : vector<4xf32>
    %87 = vector.multi_reduction <minimumf>, %86, %cst_33 [1] : vector<4x160xf32> to vector<4xf32>
    %88 = vector.shape_cast %87 : vector<4xf32> to vector<4x1xf32>
    %89 = vector.broadcast %88 : vector<4x1xf32> to vector<4x160xf32>
    %90 = arith.cmpf oeq, %86, %89 : vector<4x160xf32>
    %c160_i32_34 = arith.constant 160 : i32
    %91 = vector.broadcast %c160_i32_34 : i32 to vector<4x160xi32>
    %92 = arith.select %90, %11, %91 : vector<4x160xi1>, vector<4x160xi32>
    %cst_35 = arith.constant dense<2147483647> : vector<4xi32>
    %93 = vector.multi_reduction <minsi>, %92, %cst_35 [1] : vector<4x160xi32> to vector<4xi32>
    %94 = vector.shape_cast %93 : vector<4xi32> to vector<4x1xi32>
    %95 = vector.broadcast %94 : vector<4x1xi32> to vector<4x160xi32>
    %96 = arith.cmpi eq, %11, %95 : vector<4x160xi32>
    %cst_36 = arith.constant 0x7F800000 : f32
    %97 = vector.broadcast %cst_36 : f32 to vector<4x160xf32>
    %98 = arith.select %96, %97, %86 : vector<4x160xi1>, vector<4x160xf32>
    %cst_37 = arith.constant dense<0x7F800000> : vector<4xf32>
    %99 = vector.multi_reduction <minimumf>, %98, %cst_37 [1] : vector<4x160xf32> to vector<4xf32>
    %100 = vector.shape_cast %99 : vector<4xf32> to vector<4x1xf32>
    %101 = vector.broadcast %100 : vector<4x1xf32> to vector<4x160xf32>
    %102 = arith.cmpf oeq, %98, %101 : vector<4x160xf32>
    %c160_i32_38 = arith.constant 160 : i32
    %103 = vector.broadcast %c160_i32_38 : i32 to vector<4x160xi32>
    %104 = arith.select %102, %11, %103 : vector<4x160xi1>, vector<4x160xi32>
    %cst_39 = arith.constant dense<2147483647> : vector<4xi32>
    %105 = vector.multi_reduction <minsi>, %104, %cst_39 [1] : vector<4x160xi32> to vector<4xi32>
    %106 = vector.shape_cast %105 : vector<4xi32> to vector<4x1xi32>
    %107 = vector.broadcast %106 : vector<4x1xi32> to vector<4x160xi32>
    %108 = arith.cmpi eq, %11, %107 : vector<4x160xi32>
    %cst_40 = arith.constant 0x7F800000 : f32
    %109 = vector.broadcast %cst_40 : f32 to vector<4x160xf32>
    %110 = arith.select %108, %109, %98 : vector<4x160xi1>, vector<4x160xf32>
    %cst_41 = arith.constant dense<0x7F800000> : vector<4xf32>
    %111 = vector.multi_reduction <minimumf>, %110, %cst_41 [1] : vector<4x160xf32> to vector<4xf32>
    %112 = vector.shape_cast %111 : vector<4xf32> to vector<4x1xf32>
    %113 = tpu.concatenate %64, %76, %88, %100, %112 in 1 : vector<4x1xf32>, vector<4x1xf32>, vector<4x1xf32>, vector<4x1xf32>, vector<4x1xf32> -> vector<4x5xf32>
    %c0_42 = arith.constant 0 : index
    %c0_43 = arith.constant 0 : index
    %114 = vector.load %arg7[%c0_42, %c0_43] : memref<4x128xf32, #tpu.memory_space<vmem>>, vector<4x5xf32>
    tpu.vector_store %arg7[%c0_42, %c0_43], %62 {strides = array<i32>} : memref<4x128xf32, #tpu.memory_space<vmem>>, vector<4x5xf32>,
    %c0_44 = arith.constant 0 : index
    %c0_45 = arith.constant 0 : index
    %115 = vector.load %arg8[%c0_44, %c0_45] : memref<4x128xf32, #tpu.memory_space<vmem>>, vector<4x5xf32>
    tpu.vector_store %arg8[%c0_44, %c0_45], %113 {strides = array<i32>} : memref<4x128xf32, #tpu.memory_space<vmem>>, vector<4x5xf32>,
    %c0_i32_46 = arith.constant 0 : i32
    %116 = arith.cmpi eq, %arg1, %c0_i32_46 : i32
    %117 = arith.extui %116 : i1 to i32
    %c0_i32_47 = arith.constant 0 : i32
    %118 = arith.cmpi ne, %117, %c0_i32_47 : i32
    scf.if %118 {
      %cst_48 = arith.constant 0.000000e+00 : f32
      %119 = vector.broadcast %cst_48 : f32 to vector<4x1xf32>
      %c0_49 = arith.constant 0 : index
      %120 = memref.load %arg5[%c0_49] : memref<10xf32, #tpu.memory_space<smem>>
      %121 = vector.extract_strided_slice %62 {offsets = [0, 0], sizes = [4, 1], strides = [1, 1]} : vector<4x5xf32> to vector<4x1xf32>
      %122 = vector.broadcast %120 : f32 to vector<4x1xf32>
      %123 = arith.mulf %122, %121 : vector<4x1xf32>
      %124 = arith.addf %119, %123 : vector<4x1xf32>
      %c1 = arith.constant 1 : index
      %125 = memref.load %arg5[%c1] : memref<10xf32, #tpu.memory_space<smem>>
      %126 = vector.extract_strided_slice %62 {offsets = [0, 1], sizes = [4, 1], strides = [1, 1]} : vector<4x5xf32> to vector<4x1xf32>
      %127 = vector.broadcast %125 : f32 to vector<4x1xf32>
      %128 = arith.mulf %127, %126 : vector<4x1xf32>
      %129 = arith.addf %124, %128 : vector<4x1xf32>
      %c2 = arith.constant 2 : index
      %130 = memref.load %arg5[%c2] : memref<10xf32, #tpu.memory_space<smem>>
      %131 = vector.extract_strided_slice %62 {offsets = [0, 2], sizes = [4, 1], strides = [1, 1]} : vector<4x5xf32> to vector<4x1xf32>
      %132 = vector.broadcast %130 : f32 to vector<4x1xf32>
      %133 = arith.mulf %132, %131 : vector<4x1xf32>
      %134 = arith.addf %129, %133 : vector<4x1xf32>
      %c3 = arith.constant 3 : index
      %135 = memref.load %arg5[%c3] : memref<10xf32, #tpu.memory_space<smem>>
      %136 = vector.extract_strided_slice %62 {offsets = [0, 3], sizes = [4, 1], strides = [1, 1]} : vector<4x5xf32> to vector<4x1xf32>
      %137 = vector.broadcast %135 : f32 to vector<4x1xf32>
      %138 = arith.mulf %137, %136 : vector<4x1xf32>
      %139 = arith.addf %134, %138 : vector<4x1xf32>
      %c4 = arith.constant 4 : index
      %140 = memref.load %arg5[%c4] : memref<10xf32, #tpu.memory_space<smem>>
      %141 = vector.extract_strided_slice %62 {offsets = [0, 4], sizes = [4, 1], strides = [1, 1]} : vector<4x5xf32> to vector<4x1xf32>
      %142 = vector.broadcast %140 : f32 to vector<4x1xf32>
      %143 = arith.mulf %142, %141 : vector<4x1xf32>
      %144 = arith.addf %139, %143 : vector<4x1xf32>
      %c5 = arith.constant 5 : index
      %145 = memref.load %arg5[%c5] : memref<10xf32, #tpu.memory_space<smem>>
      %146 = vector.extract_strided_slice %113 {offsets = [0, 0], sizes = [4, 1], strides = [1, 1]} : vector<4x5xf32> to vector<4x1xf32>
      %147 = vector.broadcast %145 : f32 to vector<4x1xf32>
      %148 = arith.mulf %147, %146 : vector<4x1xf32>
      %149 = arith.addf %144, %148 : vector<4x1xf32>
      %c6 = arith.constant 6 : index
      %150 = memref.load %arg5[%c6] : memref<10xf32, #tpu.memory_space<smem>>
      %151 = vector.extract_strided_slice %113 {offsets = [0, 1], sizes = [4, 1], strides = [1, 1]} : vector<4x5xf32> to vector<4x1xf32>
      %152 = vector.broadcast %150 : f32 to vector<4x1xf32>
      %153 = arith.mulf %152, %151 : vector<4x1xf32>
      %154 = arith.addf %149, %153 : vector<4x1xf32>
      %c7 = arith.constant 7 : index
      %155 = memref.load %arg5[%c7] : memref<10xf32, #tpu.memory_space<smem>>
      %156 = vector.extract_strided_slice %113 {offsets = [0, 2], sizes = [4, 1], strides = [1, 1]} : vector<4x5xf32> to vector<4x1xf32>
      %157 = vector.broadcast %155 : f32 to vector<4x1xf32>
      %158 = arith.mulf %157, %156 : vector<4x1xf32>
      %159 = arith.addf %154, %158 : vector<4x1xf32>
      %c8 = arith.constant 8 : index
      %160 = memref.load %arg5[%c8] : memref<10xf32, #tpu.memory_space<smem>>
      %161 = vector.extract_strided_slice %113 {offsets = [0, 3], sizes = [4, 1], strides = [1, 1]} : vector<4x5xf32> to vector<4x1xf32>
      %162 = vector.broadcast %160 : f32 to vector<4x1xf32>
      %163 = arith.mulf %162, %161 : vector<4x1xf32>
      %164 = arith.addf %159, %163 : vector<4x1xf32>
      %c9 = arith.constant 9 : index
      %165 = memref.load %arg5[%c9] : memref<10xf32, #tpu.memory_space<smem>>
      %166 = vector.extract_strided_slice %113 {offsets = [0, 4], sizes = [4, 1], strides = [1, 1]} : vector<4x5xf32> to vector<4x1xf32>
      %167 = vector.broadcast %165 : f32 to vector<4x1xf32>
      %168 = arith.mulf %167, %166 : vector<4x1xf32>
      %169 = arith.addf %164, %168 : vector<4x1xf32>
      %170 = vector.shape_cast %169 : vector<4x1xf32> to vector<1x4xf32>
      %c0_50 = arith.constant 0 : index
      %c0_51 = arith.constant 0 : index
      %171 = vector.load %arg4[%c0_50, %c0_51] : memref<1x4xf32, #tpu.memory_space<vmem>>, vector<1x4xf32>
      %172 = arith.addf %170, %171 : vector<1x4xf32>
      %c0_52 = arith.constant 0 : index
      %c0_53 = arith.constant 0 : index
      %c0_54 = arith.constant 0 : index
      %173 = vector.load %arg6[%c0_52, %c0_53, %c0_54] : memref<1x1x4xf32, #tpu.memory_space<vmem>>, vector<1x1x4xf32>
      %174 = vector.shape_cast %173 : vector<1x1x4xf32> to vector<1x4xf32>
      %175 = vector.shape_cast %172 : vector<1x4xf32> to vector<1x1x4xf32>
      tpu.vector_store %arg6[%c0_52, %c0_53, %c0_54], %175 {strides = array<i32>} : memref<1x1x4xf32, #tpu.memory_space<vmem>>, vector<1x1x4xf32>,
    } else {
    }
    return
  }
  func.func @transform_0(%arg0: i32, %arg1: i32) -> (i32, i32, i32) {
    %c0_i32 = arith.constant 0 : i32
    %c0_i32_0 = arith.constant 0 : i32
    return %arg0, %c0_i32, %arg1 : i32, i32, i32
  }
  func.func @transform_1(%arg0: i32, %arg1: i32) -> (i32, i32) {
    %c0_i32 = arith.constant 0 : i32
    %c0_i32_0 = arith.constant 0 : i32
    %c0_i32_1 = arith.constant 0 : i32
    return %c0_i32, %c0_i32_0 : i32, i32
  }
  func.func @transform_2(%arg0: i32, %arg1: i32) -> (i32, i32) {
    %c0_i32 = arith.constant 0 : i32
    %c0_i32_0 = arith.constant 0 : i32
    %c0_i32_1 = arith.constant 0 : i32
    return %c0_i32, %c0_i32_0 : i32, i32
  }
  func.func @transform_3(%arg0: i32, %arg1: i32) -> i32 {
    %c0_i32 = arith.constant 0 : i32
    %c0_i32_0 = arith.constant 0 : i32
    return %c0_i32 : i32
  }
  func.func @transform_4(%arg0: i32, %arg1: i32) -> (i32, i32, i32) {
    %c0_i32 = arith.constant 0 : i32
    %c0_i32_0 = arith.constant 0 : i32
    %c0_i32_1 = arith.constant 0 : i32
    return %arg0, %c0_i32, %c0_i32_0 : i32, i32, i32
  }
}

</mosaic_0001>

<bundles_post_ra>
// kernel: tpu_custom_call.1
= control target key start
LH: loop header
LB: loop body
LE: loop exit
PB: predicated region body
PF: predicated region fallthrough
CT: control target
= control target key end

     0   :  { %9 = vsyncpa [#allocation5], 0  ;;  %s1456_s0 = inlined_call_operand.hbm [shape: bf16[2,32,32], index: 0, kind: input, shape index: {}]   ;;  %s1457_s1 = inlined_call_operand.vmem [shape: bf16[4,32], index: 1, kind: input, shape index: {}]   ;;  %s1458_s2 = inlined_call_operand.vmem [shape: f32[1,4], index: 2, kind: input, shape index: {}]   ;;  %s1459_s3 = inlined_call_operand.vmem [shape: f32[10], index: 3, kind: input, shape index: {}]   ;;  %s1460_s4 = inlined_call_operand.hbm [shape: f32[2,1,4], index: 4, kind: output, shape index: {}]  }
   0x1   :  { %11 = vsyncpa [#allocation5 + $0x1], 0 }
   0x2   :  { %12 = vsyncpa [#allocation7], 0 }
   0x3   :  { %13 = vsyncpa [#allocation6], 0 }
   0x4   :  { %15 = vsyncpa [#allocation6 + $0x1], 0  ;;  %s1089_s15 = smov 0   ;;  %s1091_s16 = smov 0  }
   0x5   :  { %s1093_s17 = smov 0   ;;  %s1095_s18 = smov 0  }
   0x6   :  { %s1097_s19 = smov 0   ;;  %s1099_s20 = smov 0  }
   0x7 LB: > { %s790_s21 = sadd.s32 4294967295, %s1048_s20   ;;  %s791_s22 = sadd.s32 4294967294, %s1048_s20   ;;  %s1048_s20 = sphi %s1099_s20, %s21_s20   ;;  %s1044_s19 = sphi %s1097_s19, %s1483_s19   ;;  %s1040_s18 = sphi %s1095_s18, %s1482_s18   ;;  %s1036_s17 = sphi %s1093_s17, %s1481_s17   ;;  %s1032_s16 = sphi %s1091_s16, %s1480_s16   ;;  %s1028_s15 = sphi %s1089_s15, %s1479_s15  }
   0x8   : > { %s42_s23 = sadd.s32 1, %s1036_s17  ;;  %p49_p0 = scmp.ne.s32.totalorder %s1036_s17, %s1032_s16 }
   0x9   : > { %p50_p1 = scmp.eq.s32.totalorder %s1048_s20, 0  ;;  %p55_p2 = scmp.ne.s32.totalorder %s1032_s16, %s1028_s15 }
   0xa   : > { %p1127_p3 = scmp.eq.s32.totalorder %s790_s21, 0  ;;  %p142_p4 = scmp.eq.s32.totalorder %s790_s21, 1 }
   0xb   : > { %p1131_p5 = por %p50_p1, %p49_p0  ;;  %p148_p6 = scmp.eq.s32.totalorder %s791_s22, 1 }
   0xc   : > { %s1465_s24 = scalar_select %p1127_p3, 1, 0 }
   0xd   : > { %p1137_p7 = por %p1127_p3, %p55_p2  ;;  %p1141_p8 = por %p142_p4, %p49_p0 }
   0xe   : > { %p1145_p9 = por %p148_p6, %p55_p2  ;;  %p792_p10 = scmp.ge.s32.totalorder %s1048_s20, 1 }
   0xf   : > { %s1467_s26 = scalar_select %p1137_p7, 1, 0 }
  0x10   : > { %s1468_s27 = scalar_select %p1141_p8, 1, 0 }
  0x11   : > { %s1469_s28 = scalar_select %p1145_p9, 1, 0 }
  0x12   : > { %p155_p11 = scmp.lt.s32.totalorder %s1048_s20, 3  ;;  %s174_s5 = sshll.u32 %s1459_s3, 4  ;;  %s175_s5 = int_to_ptr.vmem [resolvable:$true] %s174_s5 }
  0x13   : > { %p850_p0 = scmp.lt.s32.totalorder %s1048_s20, 2  ;;  %s33_s9 = sadd.s32 1, %s1044_s19 }
  0x14   : > { %p1154_p12 = pnand %p792_p10, %p155_p11  ;;  %p1175_p6 = scmp.ge.s32.totalorder %s33_s9, 2 }
  0x15   : > { %p1164_p2 = pnand %p850_p0, %p1131_p5  ;;  %s185_s11 = sand.u32 1, %s1036_s17  }
  0x16   : > { %p837_p1 = pneg %p1154_p12  ;;  %s917_s12 = scalar_lea.vmem %s175_s5, 16 }
  0x17   : > { %p918_p10 = scmp.ne.s32.totalorder %s175_s5, %s917_s12  ;;  %p925_p13 = scmp.lt.s32.totalorder %s175_s5, %s175_s5 }
  0x18   : > { %p1170_p4 = pnand %p837_p1, %p1127_p3  ;;  %p926_p9 = scmp.lt.s32.totalorder %s917_s12, %s917_s12 }
  0x1a   : > { %p919_p11 = pneg %p1170_p4  ;;  %p927_p8 = por %p926_p9, %p925_p13 }
  0x1c   : > { %p920_p5 = pnand %p919_p11, %p918_p10 }
  0x1e   : > { %p921_p0 = pneg %p920_p5 }
  0x20   : > { %p928_p1 = pnand %p927_p8, %p921_p0 }
  0x22   : > { %931 = shalt.err (!%p928_p1)
}
  0x23   : > { %s1050_s13 = smov [#allocation8]   ;;  %s1485_s9 = smov (%p1175_p6, %s33_s9), 0 }
  0x24   : > { %840 = dma.vmem_to_smem (!%p1170_p4), %s175_s5, 16, %s1050_s13, [#allocation7]  }
  0x25   : > { %s795_s14 = sshll.u32 %s185_s11, 4  ;;  %s37_s21 = ssub.s32 %s1044_s19, %s1485_s9 }
  0x26   : > { %p40_p9 = scmp.eq.s32.totalorder %s37_s21, 0  ;;  %s817_s22 = sshll.u32 %s1044_s19, 8 }
  0x27   : > { %s1194_s30 = scalar_lea.hbm %s1456_s0, %s817_s22  ;;  %s189_s8 = scalar_lea.vmem [#allocation4], %s795_s14 }
  0x28   : > { %s197_s12 = sshll.u32 %s189_s8, 4  ;;  %s1203_s10 = scalar_lea.sflag [#allocation5], %s185_s11  ;;  %s1201_s12 = int_to_ptr.vmem [resolvable:$true] %s197_s12 }
  0x29   : > { %s1199_s5 = scalar_select %p40_p9, %s1036_s17, %s42_s23  }
  0x2a   : > { %s932_s13 = scalar_lea.hbm %s1194_s30, 256  ;;  %p934_p13 = pneg %p1164_p2 }
  0x2b   : > { %p933_p8 = scmp.ne.s32.totalorder %s1194_s30, %s932_s13  ;;  %s937_s14 = scalar_lea.hbm %s1456_s0, 512 }
  0x2c   : > { %p938_p10 = scmp.lt.u32.totalorder %s1194_s30, %s1456_s0  ;;  %p939_p11 = scmp.lt.u32.totalorder %s937_s14, %s932_s13 }
  0x2d   : > { %p935_p4 = pnand %p934_p13, %p933_p8  ;;  %p941_p0 = scmp.lt.u32.totalorder %s932_s13, %s1194_s30 }
  0x2e   : > { %p940_p5 = por %p939_p11, %p938_p10 }
  0x2f   : > { %p936_p6 = pneg %p935_p4 }
  0x30   : > { %p942_p1 = por %p941_p0, %p940_p5 }
  0x32   : > { %p943_p9 = pnand %p942_p1, %p936_p6 }
  0x34   : > { %946 = shalt.err (!%p943_p9)
}
  0x35   : > { %s947_s23 = scalar_lea.vmem %s1201_s12, 256  ;;  %s1051_s11 = smov [#allocation4]  }
  0x36   : > { %p948_p8 = scmp.ne.s32.totalorder %s1201_s12, %s947_s23  ;;  %s952_s8 = sshll.u32 %s1051_s11, 4  ;;  %s953_s8 = int_to_ptr.vmem [resolvable:$false] %s952_s8 }
  0x37   : > { %s954_s21 = scalar_lea.vmem %s953_s8, 512  ;;  %p955_p7 = scmp.lt.s32.totalorder %s1201_s12, %s953_s8 }
  0x38   : > { %p950_p4 = pnand %p948_p8, %p934_p13  ;;  %p956_p10 = scmp.lt.s32.totalorder %s954_s21, %s947_s23 }
  0x3a   : > { %p951_p3 = pneg %p950_p4  ;;  %p957_p11 = por %p956_p10, %p955_p7 }
  0x3c   : > { %p958_p5 = pnand %p957_p11, %p951_p3 }
  0x3e   : > { %961 = shalt.err (!%p958_p5)
}
  0x3f   : > { %s1052_s13 = smov 64   ;;  %s1053_s22 = smov 4  }
  0x40   : > { %844 = dma.hbm_to_vmem [thread:$0]  (!%p1164_p2), %s1194_s30, 256, %s1201_s12, %s1203_s10, %s1052_s13, %s1052_s13, %s1053_s22  }
  0x41   : > { %209 = sbr.rel (%p1154_p12) target bundleno = 2512 (0x9d0), region = 36  ;;  %s1234_s14 = sand.u32 (!%p1154_p12), 1, %s1032_s16  }
  0x42   : > { %s799_s25 = sshll.u32 (!%p1154_p12), %s1234_s14, 4  ;;  %s212_s29 = scalar_lea.sflag (!%p1154_p12), [#allocation5], %s1234_s14 }
  0x43   : > { %s215_s23 = scalar_lea.vmem (!%p1154_p12), [#allocation4], %s799_s25  ;;  %p1474_p3 = scmp.ne.s32.totalorder (!%p1154_p12), %s1467_s26, 0 }
  0x48   : > { %1015 = dma.done.wait (%p1474_p3), %s212_s29, 256  }
  0x49   : > { %1017 = vsyncadd (%p1474_p3), %s212_s29, 4294967040  ;;  %p1475_p7 = scmp.ne.s32.totalorder %s1465_s24, 0 }
  0x4b   : > { %1019 = dma.done.wait (%p1475_p7), [#allocation7], 16  }
  0x4c   : > { %1021 = vsyncadd (%p1475_p7), [#allocation7], 4294967280 }
  0x4d   : > { %224 = sfence }
  0x4e   : > { %v915_v0 = vld [vmem:[%s215_s23] sm:$0xff]   ;;  %v1054_v1 = vmov 0.0   ;;  %v916_v2 = vld [vmem:[%s215_s23 + $0x8] sm:$0xff]   ;;  %vm1055_vm0 = vmmov 0   ;;  %vm268_vm1 = vcmask 261120   ;;  %v1056_v4 = vmov -inf  }
  0x4f   : > { %821 = vmatprep.subr.bf16.mxu0 %v1054_v1  ;;  %825 = vmatprep.mubr.msk.bf16.mxu0 %vm1055_vm0, %v1054_v1  ;;  %v251_v3 = vld [vmem:[%s1457_s1] sm:$0x3]  ;;  %249 = vst [vmem:[#allocation2] sm:$0xf] %v1056_v4  ;;  %v1057_v5 = vmov inf   ;;  %vm317_vm2 = vcmask 1043456   ;;  %v314_v18 = vlaneseq }
  0x50   : > { %822 = vmatpush3.bf16.msra.mxu0 %v915_v0  ;;  %250 = vst [vmem:[#allocation3] sm:$0xf] %v1057_v5  ;;  %vm319_vm3 = vcmask 257024   ;;  %s805_s24 = sld [smem:[#allocation8 + $0x2]]  ;;  %s804_s26 = sld [smem:[#allocation8 + $0x1]] }
  0x51   : > { %823 = vmatprep.subr.bf16.mxu0 %v1054_v1  ;;  %v1264_v19 = vand.u32 127, %v314_v18  ;;  %s1373_s30 = sld [smem:[#allocation8 + $0x3]]  ;;  %s1375_s12 = sld [smem:[#allocation8 + $0x6]] }
  0x52   : > { %s807_s10 = sld [smem:[#allocation8 + $0x4]]  ;;  %s811_s11 = sld [smem:[#allocation8 + $0x8]] }
  0x53   : > { %v1267_v20 = vadd.s32 128, %v1264_v19  ;;  %s810_s8 = sld [smem:[#allocation8 + $0x7]]  ;;  %s1058_s21 = smov 126  }
  0x54   : > { %824 = vmatpush3.bf16.msra.mxu0 %v916_v2  ;;  %s1059_s13 = smov 127   ;;  %s812_s22 = sld [smem:[#allocation8 + $0x9]] }
  0x55   : > { %s1060_s25 = smov 125   ;;  %s1061_s29 = smov 124  }
  0x56   : > { %v1249_v6 = vld [vmem:[#allocation2] sm:$0xf]  ;;  %s595_s7 = sld [smem:[#allocation8]]  ;;  %p1476_p2 = scmp.ne.s32.totalorder %s1468_s27, 0 }
  0x57   : > { %826 = vmatmul.mubr.msk.bf16.vlgmr.msra.gmra.mrb[0].mxu0 %vm268_vm1, %v251_v3  ;;  %v318_v7 = vsel %vm317_vm2, %v1249_v6, -inf  ;;  %v1255_v9 = vld [vmem:[#allocation3] sm:$0xf] }
  0x58   : > { %v456_v15 = vsel %vm317_vm2, %v1255_v9, inf }
 0x12a   : > { %v1253_v8 = vpop.f32.mrb[0].mxu0 }
 0x12b   : > { %v827_v10 = vpop.f32.mrb[1].mxu0  ;;  %v320_v11 = vsel %vm319_vm3, %v1253_v8, -inf  ;;  %v457_v16 = vsel %vm319_vm3, %v1253_v8, inf }
 0x12c   : > { %v309_v12 = vpop.f32.mrb[2].mxu0  ;;  %v321_v13 = vmax.f32 %v318_v7, %v320_v11  ;;  %v458_v17 = vmin.f32 %v456_v15, %v457_v16 }
 0x12d   : > { %v828_v14 = vpop.f32.mrb[3].mxu0 }
 0x12e   : > { %322 = vmax.xlane.f32.xlu0 %v321_v13 }
 0x132   : > { %459 = vmin.xlane.f32.xlu0 %v458_v17 }
 0x1bb   : > { %v1269_v21 = vpop.xlane.xlu0 %322 }
 0x1bc   : > { %vm324_vm4 = vcmp.eq.f32.partialorder %v1249_v6, %v1269_v21  ;;  %vm325_vm5 = vcmp.eq.f32.partialorder %v1253_v8, %v1269_v21 }
 0x1bd   : > { %v326_v22 = vsel %vm324_vm4, %v1264_v19, 160  ;;  %v327_v23 = vsel %vm325_vm5, %v1267_v20, 160 }
 0x1be   : > { %v328_v24 = vsel %vm317_vm2, %v326_v22, 2147483647  ;;  %v329_v25 = vsel %vm319_vm3, %v327_v23, 2147483647 }
 0x1bf   : > { %v1279_v26 = vpop.xlane.xlu0 %459  ;;  %vm330_vm6 = vcmp.lt.s32.totalorder %v328_v24, %v329_v25 }
 0x1c0   : > { %vm461_vm7 = vcmp.eq.f32.partialorder %v1255_v9, %v1279_v26  ;;  %vm462_vm8 = vcmp.eq.f32.partialorder %v1253_v8, %v1279_v26  ;;  %v331_v27 = vsel %vm330_vm6, %v328_v24, %v329_v25 }
 0x1c1   : > { %v463_v28 = vsel %vm461_vm7, %v1264_v19, 160  ;;  %v464_v29 = vsel %vm462_vm8, %v1267_v20, 160  ;;  %v333_v30 = vshra.s32 %v331_v27, 16  ;;  %v332_v37 = vand.u32 65535, %v331_v27 }
 0x1c2   : > { %v465_v31 = vsel %vm317_vm2, %v463_v28, 2147483647  ;;  %v466_v32 = vsel %vm319_vm3, %v464_v29, 2147483647 }
 0x1c3   : > { %v335_v33 = vcvt.s32.f32 %v333_v30  ;;  %vm467_vm9 = vcmp.lt.s32.totalorder %v465_v31, %v466_v32  ;;  %v334_v39 = vcvt.s32.f32 %v332_v37 }
 0x1c4   : > { %v468_v34 = vsel %vm467_vm9, %v465_v31, %v466_v32 }
 0x1c5   : > { %336 = vmin.xlane.f32.xlu1 %v335_v33  ;;  %v470_v35 = vshra.s32 %v468_v34, 16  ;;  %v469_v40 = vand.u32 65535, %v468_v34 }
 0x1c7   : > { %v472_v36 = vcvt.s32.f32 %v470_v35  ;;  %v471_v43 = vcvt.s32.f32 %v469_v40 }
 0x1c9   : > { %473 = vmin.xlane.f32.xlu1 %v472_v36 }
 0x252   : > { %v337_v38 = vpop.xlane.xlu1 %336 }
 0x253   : > { %vm338_vm10 = vcmp.eq.f32.partialorder %v335_v33, %v337_v38  ;;  %v343_v45 = vcvt.f32.s32 %v337_v38 }
 0x254   : > { %v339_v41 = vsel %vm338_vm10, %v334_v39, inf }
 0x255   : > { %340 = vmin.xlane.f32.xlu0 %v339_v41  ;;  %v344_v47 = vshll.u32 %v343_v45, 16 }
 0x256   : > { %v474_v42 = vpop.xlane.xlu1 %473 }
 0x257   : > { %vm475_vm11 = vcmp.eq.f32.partialorder %v472_v36, %v474_v42  ;;  %v480_v48 = vcvt.f32.s32 %v474_v42 }
 0x258   : > { %v476_v44 = vsel %vm475_vm11, %v471_v43, inf }
 0x259   : > { %477 = vmin.xlane.f32.xlu1 %v476_v44  ;;  %v481_v52 = vshll.u32 %v480_v48, 16 }
 0x2e2   : > { %v341_v46 = vpop.xlane.xlu0 %340 }
 0x2e3   : > { %v342_v49 = vcvt.f32.s32 %v341_v46 }
 0x2e5   : > { %v345_v50 = vadd.s32 %v344_v47, %v342_v49 }
 0x2e6   : > { %v478_v51 = vpop.xlane.xlu1 %477 }
 0x2e7   : > { %vm346_vm12 = vcmp.eq.s32.totalorder %v1264_v19, %v345_v50  ;;  %vm347_vm13 = vcmp.eq.s32.totalorder %v1267_v20, %v345_v50  ;;  %v479_v53 = vcvt.f32.s32 %v478_v51 }
 0x2e8   : > { %v348_v54 = vsel %vm346_vm12, -inf, %v1249_v6  ;;  %v349_v55 = vsel %vm347_vm13, -inf, %v1253_v8 }
 0x2e9   : > { %v482_v56 = vadd.s32 %v481_v52, %v479_v53  ;;  %v350_v57 = vsel %vm317_vm2, %v348_v54, -inf  ;;  %v351_v58 = vsel %vm319_vm3, %v349_v55, -inf }
 0x2ea   : > { %v352_v59 = vmax.f32 %v350_v57, %v351_v58 }
 0x2eb   : > { %vm483_vm14 = vcmp.eq.s32.totalorder %v1264_v19, %v482_v56  ;;  %vm484_vm15 = vcmp.eq.s32.totalorder %v1267_v20, %v482_v56 }
 0x2ec   : > { %353 = vmax.xlane.f32.xlu0 %v352_v59  ;;  %v485_v60 = vsel %vm483_vm14, inf, %v1255_v9  ;;  %v486_v61 = vsel %vm484_vm15, inf, %v1253_v8 }
 0x2ed   : > { %v487_v62 = vsel %vm317_vm2, %v485_v60, inf  ;;  %v488_v63 = vsel %vm319_vm3, %v486_v61, inf }
 0x2ee   : > { %v489_v0 = vmin.f32 %v487_v62, %v488_v63 }
 0x2f0   : > { %490 = vmin.xlane.f32.xlu1 %v489_v0 }
 0x379   : > { %v1301_v1 = vpop.xlane.xlu0 %353 }
 0x37a   : > { %vm355_vm0 = vcmp.eq.f32.partialorder %v348_v54, %v1301_v1  ;;  %vm356_vm1 = vcmp.eq.f32.partialorder %v349_v55, %v1301_v1 }
 0x37b   : > { %v357_v2 = vsel %vm355_vm0, %v1264_v19, 160  ;;  %v358_v3 = vsel %vm356_vm1, %v1267_v20, 160 }
 0x37c   : > { %v359_v4 = vsel %vm317_vm2, %v357_v2, 2147483647  ;;  %v360_v5 = vsel %vm319_vm3, %v358_v3, 2147483647 }
 0x37d   : > { %v1309_v6 = vpop.xlane.xlu1 %490  ;;  %vm361_vm4 = vcmp.lt.s32.totalorder %v359_v4, %v360_v5 }
 0x37e   : > { %vm492_vm5 = vcmp.eq.f32.partialorder %v485_v60, %v1309_v6  ;;  %vm493_vm6 = vcmp.eq.f32.partialorder %v486_v61, %v1309_v6  ;;  %v362_v7 = vsel %vm361_vm4, %v359_v4, %v360_v5 }
 0x37f   : > { %v494_v8 = vsel %vm492_vm5, %v1264_v19, 160  ;;  %v495_v9 = vsel %vm493_vm6, %v1267_v20, 160  ;;  %v364_v10 = vshra.s32 %v362_v7, 16  ;;  %v363_v17 = vand.u32 65535, %v362_v7 }
 0x380   : > { %v496_v11 = vsel %vm317_vm2, %v494_v8, 2147483647  ;;  %v497_v12 = vsel %vm319_vm3, %v495_v9, 2147483647 }
 0x381   : > { %v366_v13 = vcvt.s32.f32 %v364_v10  ;;  %vm498_vm7 = vcmp.lt.s32.totalorder %v496_v11, %v497_v12  ;;  %v365_v23 = vcvt.s32.f32 %v363_v17 }
 0x382   : > { %v499_v14 = vsel %vm498_vm7, %v496_v11, %v497_v12 }
 0x383   : > { %367 = vmin.xlane.f32.xlu0 %v366_v13  ;;  %v501_v15 = vshra.s32 %v499_v14, 16  ;;  %v500_v24 = vand.u32 65535, %v499_v14 }
 0x385   : > { %v503_v16 = vcvt.s32.f32 %v501_v15  ;;  %v502_v28 = vcvt.s32.f32 %v500_v24 }
 0x387   : > { %504 = vmin.xlane.f32.xlu1 %v503_v16 }
 0x410   : > { %v368_v22 = vpop.xlane.xlu0 %367 }
 0x411   : > { %vm369_vm8 = vcmp.eq.f32.partialorder %v366_v13, %v368_v22  ;;  %v374_v30 = vcvt.f32.s32 %v368_v22 }
 0x412   : > { %v370_v25 = vsel %vm369_vm8, %v365_v23, inf }
 0x413   : > { %371 = vmin.xlane.f32.xlu0 %v370_v25  ;;  %v375_v32 = vshll.u32 %v374_v30, 16 }
 0x414   : > { %v505_v27 = vpop.xlane.xlu1 %504 }
 0x415   : > { %vm506_vm9 = vcmp.eq.f32.partialorder %v503_v16, %v505_v27  ;;  %v511_v33 = vcvt.f32.s32 %v505_v27 }
 0x416   : > { %v507_v29 = vsel %vm506_vm9, %v502_v28, inf }
 0x417   : > { %508 = vmin.xlane.f32.xlu1 %v507_v29  ;;  %v512_v37 = vshll.u32 %v511_v33, 16 }
 0x4a0   : > { %v372_v31 = vpop.xlane.xlu0 %371 }
 0x4a1   : > { %v373_v34 = vcvt.f32.s32 %v372_v31 }
 0x4a3   : > { %v376_v35 = vadd.s32 %v375_v32, %v373_v34 }
 0x4a4   : > { %v509_v36 = vpop.xlane.xlu1 %508 }
 0x4a5   : > { %vm377_vm10 = vcmp.eq.s32.totalorder %v1264_v19, %v376_v35  ;;  %vm378_vm11 = vcmp.eq.s32.totalorder %v1267_v20, %v376_v35  ;;  %v510_v38 = vcvt.f32.s32 %v509_v36 }
 0x4a6   : > { %v379_v39 = vsel %vm377_vm10, -inf, %v348_v54  ;;  %v380_v40 = vsel %vm378_vm11, -inf, %v349_v55 }
 0x4a7   : > { %v513_v41 = vadd.s32 %v512_v37, %v510_v38  ;;  %v381_v42 = vsel %vm317_vm2, %v379_v39, -inf  ;;  %v382_v43 = vsel %vm319_vm3, %v380_v40, -inf }
 0x4a8   : > { %v383_v44 = vmax.f32 %v381_v42, %v382_v43 }
 0x4a9   : > { %vm514_vm12 = vcmp.eq.s32.totalorder %v1264_v19, %v513_v41  ;;  %vm515_vm13 = vcmp.eq.s32.totalorder %v1267_v20, %v513_v41 }
 0x4aa   : > { %384 = vmax.xlane.f32.xlu0 %v383_v44  ;;  %v516_v45 = vsel %vm514_vm12, inf, %v485_v60  ;;  %v517_v46 = vsel %vm515_vm13, inf, %v486_v61 }
 0x4ab   : > { %v518_v47 = vsel %vm317_vm2, %v516_v45, inf  ;;  %v519_v48 = vsel %vm319_vm3, %v517_v46, inf }
 0x4ac   : > { %v520_v49 = vmin.f32 %v518_v47, %v519_v48 }
 0x4ae   : > { %521 = vmin.xlane.f32.xlu1 %v520_v49 }
 0x537   : > { %v1325_v50 = vpop.xlane.xlu0 %384 }
 0x538   : > { %vm386_vm14 = vcmp.eq.f32.partialorder %v379_v39, %v1325_v50  ;;  %vm387_vm15 = vcmp.eq.f32.partialorder %v380_v40, %v1325_v50 }
 0x539   : > { %v388_v51 = vsel %vm386_vm14, %v1264_v19, 160  ;;  %v389_v52 = vsel %vm387_vm15, %v1267_v20, 160 }
 0x53a   : > { %v390_v53 = vsel %vm317_vm2, %v388_v51, 2147483647  ;;  %v391_v54 = vsel %vm319_vm3, %v389_v52, 2147483647 }
 0x53b   : > { %v1333_v55 = vpop.xlane.xlu1 %521  ;;  %vm392_vm0 = vcmp.lt.s32.totalorder %v390_v53, %v391_v54 }
 0x53c   : > { %vm523_vm1 = vcmp.eq.f32.partialorder %v516_v45, %v1333_v55  ;;  %vm524_vm4 = vcmp.eq.f32.partialorder %v517_v46, %v1333_v55  ;;  %v393_v56 = vsel %vm392_vm0, %v390_v53, %v391_v54 }
 0x53d   : > { %v525_v57 = vsel %vm523_vm1, %v1264_v19, 160  ;;  %v526_v58 = vsel %vm524_vm4, %v1267_v20, 160  ;;  %v395_v59 = vshra.s32 %v393_v56, 16  ;;  %v394_v3 = vand.u32 65535, %v393_v56 }
 0x53e   : > { %v527_v60 = vsel %vm317_vm2, %v525_v57, 2147483647  ;;  %v528_v61 = vsel %vm319_vm3, %v526_v58, 2147483647 }
 0x53f   : > { %v397_v62 = vcvt.s32.f32 %v395_v59  ;;  %vm529_vm5 = vcmp.lt.s32.totalorder %v527_v60, %v528_v61  ;;  %v396_v5 = vcvt.s32.f32 %v394_v3 }
 0x540   : > { %v530_v63 = vsel %vm529_vm5, %v527_v60, %v528_v61 }
 0x541   : > { %398 = vmin.xlane.f32.xlu0 %v397_v62  ;;  %v532_v0 = vshra.s32 %v530_v63, 16  ;;  %v531_v7 = vand.u32 65535, %v530_v63 }
 0x543   : > { %v534_v2 = vcvt.s32.f32 %v532_v0  ;;  %v533_v10 = vcvt.s32.f32 %v531_v7 }
 0x545   : > { %535 = vmin.xlane.f32.xlu1 %v534_v2 }
 0x5ce   : > { %v399_v4 = vpop.xlane.xlu0 %398 }
 0x5cf   : > { %vm400_vm6 = vcmp.eq.f32.partialorder %v397_v62, %v399_v4  ;;  %v405_v12 = vcvt.f32.s32 %v399_v4 }
 0x5d0   : > { %v401_v8 = vsel %vm400_vm6, %v396_v5, inf }
 0x5d1   : > { %402 = vmin.xlane.f32.xlu0 %v401_v8  ;;  %v406_v14 = vshll.u32 %v405_v12, 16 }
 0x5d2   : > { %v536_v9 = vpop.xlane.xlu1 %535 }
 0x5d3   : > { %vm537_vm7 = vcmp.eq.f32.partialorder %v534_v2, %v536_v9  ;;  %v542_v15 = vcvt.f32.s32 %v536_v9 }
 0x5d4   : > { %v538_v11 = vsel %vm537_vm7, %v533_v10, inf }
 0x5d5   : > { %539 = vmin.xlane.f32.xlu1 %v538_v11  ;;  %v543_v23 = vshll.u32 %v542_v15, 16 }
 0x65e   : > { %v403_v13 = vpop.xlane.xlu0 %402 }
 0x65f   : > { %v404_v16 = vcvt.f32.s32 %v403_v13 }
 0x661   : > { %v407_v17 = vadd.s32 %v406_v14, %v404_v16 }
 0x662   : > { %v540_v22 = vpop.xlane.xlu1 %539 }
 0x663   : > { %vm408_vm8 = vcmp.eq.s32.totalorder %v1264_v19, %v407_v17  ;;  %vm409_vm9 = vcmp.eq.s32.totalorder %v1267_v20, %v407_v17  ;;  %v541_v24 = vcvt.f32.s32 %v540_v22 }
 0x664   : > { %v410_v25 = vsel %vm408_vm8, -inf, %v379_v39  ;;  %v411_v27 = vsel %vm409_vm9, -inf, %v380_v40 }
 0x665   : > { %v544_v28 = vadd.s32 %v543_v23, %v541_v24  ;;  %v412_v29 = vsel %vm317_vm2, %v410_v25, -inf  ;;  %v413_v30 = vsel %vm319_vm3, %v411_v27, -inf }
 0x666   : > { %v414_v31 = vmax.f32 %v412_v29, %v413_v30 }
 0x667   : > { %vm545_vm10 = vcmp.eq.s32.totalorder %v1264_v19, %v544_v28  ;;  %vm546_vm11 = vcmp.eq.s32.totalorder %v1267_v20, %v544_v28  ;;  %v600_v28 = vstv %s804_s26  ;;  %s814_s26 = sshll.u32 %s1040_s18, 4  ;;  %s1063_s18 = smov [#allocation9]  }
 0x668   : > { %415 = vmax.xlane.f32.xlu0 %v414_v31  ;;  %v547_v32 = vsel %vm545_vm10, inf, %v516_v45  ;;  %v548_v33 = vsel %vm546_vm11, inf, %v517_v46  ;;  %vm448_vm10 = vcmask 7168   ;;  %vm450_vm11 = vcmask 15360  }
 0x669   : > { %v549_v34 = vsel %vm317_vm2, %v547_v32, inf  ;;  %v550_v35 = vsel %vm319_vm3, %v548_v33, inf }
 0x66a   : > { %v551_v36 = vmin.f32 %v549_v34, %v550_v35  ;;  %v636_v34 = vstv %s1375_s12 }
 0x66c   : > { %552 = vmin.xlane.f32.xlu1 %v551_v36 }
 0x6f5   : > { %v1349_v37 = vpop.xlane.xlu0 %415 }
 0x6f6   : > { %vm417_vm12 = vcmp.eq.f32.partialorder %v410_v25, %v1349_v37  ;;  %vm418_vm13 = vcmp.eq.f32.partialorder %v411_v27, %v1349_v37 }
 0x6f7   : > { %v419_v38 = vsel %vm417_vm12, %v1264_v19, 160  ;;  %v420_v39 = vsel %vm418_vm13, %v1267_v20, 160  ;;  %vm452_vm12 = vcmask 23552   ;;  %vm454_vm13 = vcmask 31744  }
 0x6f8   : > { %v421_v40 = vsel %vm317_vm2, %v419_v38, 2147483647  ;;  %v422_v41 = vsel %vm319_vm3, %v420_v39, 2147483647  ;;  %v624_v38 = vstv %s807_s10  ;;  %v652_v39 = vstv %s811_s11 }
 0x6f9   : > { %v1357_v42 = vpop.xlane.xlu1 %552  ;;  %vm423_vm14 = vcmp.lt.s32.totalorder %v421_v40, %v422_v41 }
 0x6fa   : > { %vm554_vm15 = vcmp.eq.f32.partialorder %v547_v32, %v1357_v42  ;;  %vm555_vm0 = vcmp.eq.f32.partialorder %v548_v33, %v1357_v42  ;;  %v424_v43 = vsel %vm423_vm14, %v421_v40, %v422_v41  ;;  %v644_v41 = vstv %s810_s8  ;;  %s1407_s8 = scalar_lea.hbm %s1460_s4, %s814_s26 }
 0x6fb   : > { %v556_v44 = vsel %vm554_vm15, %v1264_v19, 160  ;;  %v557_v45 = vsel %vm555_vm0, %v1267_v20, 160  ;;  %v426_v46 = vshra.s32 %v424_v43, 16  ;;  %v425_v54 = vand.u32 65535, %v424_v43 }
 0x6fc   : > { %v558_v47 = vsel %vm317_vm2, %v556_v44, 2147483647  ;;  %v559_v48 = vsel %vm319_vm3, %v557_v45, 2147483647  ;;  %v1062_v43 = vmov 0   ;;  %v660_v45 = vstv %s812_s22  ;;  %s966_s22 = sshll.u32 %s1063_s18, 4  ;;  %s967_s22 = int_to_ptr.vmem [resolvable:$false] %s966_s22 }
 0x6fd   : > { %v428_v49 = vcvt.s32.f32 %v426_v46  ;;  %vm560_vm1 = vcmp.lt.s32.totalorder %v558_v47, %v559_v48  ;;  %v427_v57 = vcvt.s32.f32 %v425_v54  ;;  %913 = vset.pattern.permute.xlu1 %v1062_v43  ;;  %914 = vset.pattern.permute.xlu0 %v1062_v43 }
 0x6fe   : > { %v561_v51 = vsel %vm560_vm1, %v558_v47, %v559_v48  ;;  %v596_v47 = vstv %s595_s7 }
 0x6ff   : > { %429 = vmin.xlane.f32.xlu0 %v428_v49  ;;  %v563_v52 = vshra.s32 %v561_v51, 16  ;;  %v562_v58 = vand.u32 65535, %v561_v51 }
 0x701   : > { %v565_v53 = vcvt.s32.f32 %v563_v52  ;;  %v564_v61 = vcvt.s32.f32 %v562_v58 }
 0x703   : > { %566 = vmin.xlane.f32.xlu1 %v565_v53 }
 0x78c   : > { %v430_v56 = vpop.xlane.xlu0 %429 }
 0x78d   : > { %vm431_vm4 = vcmp.eq.f32.partialorder %v428_v49, %v430_v56  ;;  %v436_v63 = vcvt.f32.s32 %v430_v56 }
 0x78e   : > { %v432_v59 = vsel %vm431_vm4, %v427_v57, inf }
 0x78f   : > { %433 = vmin.xlane.f32.xlu0 %v432_v59  ;;  %v437_v2 = vshll.u32 %v436_v63, 16 }
 0x790   : > { %v567_v60 = vpop.xlane.xlu1 %566 }
 0x791   : > { %vm568_vm5 = vcmp.eq.f32.partialorder %v565_v53, %v567_v60  ;;  %v573_v3 = vcvt.f32.s32 %v567_v60 }
 0x792   : > { %v569_v62 = vsel %vm568_vm5, %v564_v61, inf }
 0x793   : > { %570 = vmin.xlane.f32.xlu1 %v569_v62  ;;  %v574_v8 = vshll.u32 %v573_v3, 16 }
 0x81c   : > { %v434_v0 = vpop.xlane.xlu0 %433 }
 0x81d   : > { %v435_v4 = vcvt.f32.s32 %v434_v0 }
 0x81f   : > { %v438_v5 = vadd.s32 %v437_v2, %v435_v4 }
 0x820   : > { %v571_v7 = vpop.xlane.xlu1 %570 }
 0x821   : > { %v572_v9 = vcvt.f32.s32 %v571_v7  ;;  %vm439_vm6 = vcmp.eq.s32.totalorder %v1264_v19, %v438_v5  ;;  %vm440_vm7 = vcmp.eq.s32.totalorder %v1267_v20, %v438_v5 }
 0x822   : > { %v441_v10 = vsel %vm439_vm6, -inf, %v410_v25  ;;  %v442_v11 = vsel %vm440_vm7, -inf, %v411_v27  ;;  %v608_v27 = vstv %s805_s24  ;;  %s808_s24 = sld [smem:[#allocation8 + $0x5]] }
 0x823   : > { %v575_v12 = vadd.s32 %v574_v8, %v572_v9  ;;  %v443_v13 = vsel %vm317_vm2, %v441_v10, -inf  ;;  %v444_v14 = vsel %vm319_vm3, %v442_v11, -inf  ;;  %v683_v10 = vshrl.u32 %v314_v18, 7 }
 0x824   : > { %v445_v15 = vmax.f32 %v443_v13, %v444_v14 }
 0x825   : > { %vm576_vm8 = vcmp.eq.s32.totalorder %v1264_v19, %v575_v12  ;;  %vm577_vm9 = vcmp.eq.s32.totalorder %v1267_v20, %v575_v12  ;;  %v449_v20 = vsel %vm448_vm10, %v1269_v21, %v1301_v1  ;;  %v585_v21 = vsel %vm448_vm10, %v1279_v26, %v1309_v6 }
 0x826   : > { %446 = vmax.xlane.f32.xlu0 %v445_v15  ;;  %v578_v16 = vsel %vm576_vm8, inf, %v547_v32  ;;  %v579_v17 = vsel %vm577_vm9, inf, %v548_v33  ;;  %v451_v25 = vsel %vm450_vm11, %v449_v20, %v1325_v50  ;;  %v586_v50 = vsel %vm450_vm11, %v585_v21, %v1333_v55 }
 0x827   : > { %v580_v22 = vsel %vm317_vm2, %v578_v16, inf  ;;  %v581_v23 = vsel %vm319_vm3, %v579_v17, inf  ;;  %vm589_vm2 = vcmask 35840   ;;  %v453_v29 = vsel %vm452_vm12, %v451_v25, %v1349_v37 }
 0x828   : > { %v582_v24 = vmin.f32 %v580_v22, %v581_v23  ;;  %v616_v33 = vstv %s1373_s30  ;;  %v587_v35 = vsel %vm452_vm12, %v586_v50, %v1357_v42  ;;  %v813_v42 = vld [vmem:[%s1458_s2] ss:$0 sm:$0xff]  ;;  %v632_v56 = vstv %s808_s24  ;;  %s243_s30 = scalar_lea.vmem [#allocation9], %s1234_s14 }
 0x829   : > { %v684_v11 = vsub.s32 %v1264_v19, %v683_v10  ;;  %s702_s12 = sshll.u32 %s243_s30, 4  ;;  %vm687_vm3 = vcmask 24576   ;;  %s1409_s12 = int_to_ptr.vmem [resolvable:$true] %s702_s12 }
 0x82a   : > { %583 = vmin.xlane.f32.xlu1 %v582_v24  ;;  %p969_p0 = scmp.lt.s32.totalorder %s1409_s12, %s967_s22 }
 0x8b3   : > { %v447_v30 = vpop.xlane.xlu0 %446 }
 0x8b4   : > { %v455_v31 = vsel %vm454_vm13, %v453_v29, %v447_v30 }
 0x8b5   : > { %590 = vst.msk [vmem:[#allocation2] sm:$0xf] %vm589_vm2, %v455_v31  ;;  %v609_v1 = vmul.f32 %v608_v27, %v455_v31  ;;  %v601_v32 = vmul.f32 %v600_v28, %v455_v31  ;;  %v617_v6 = vmul.f32 %v616_v33, %v455_v31  ;;  %v625_v55 = vmul.f32 %v624_v38, %v455_v31 }
 0x8b6   : > { %v597_v48 = vmul.f32 %v596_v47, %v455_v31 }
 0x8b7   : > { %v584_v36 = vpop.xlane.xlu1 %583  ;;  %611 = vrot.lane.b32.xlu1 %v609_v1, %s1058_s21  ;;  %603 = vrot.lane.b32.xlu0 %v601_v32, %s1059_s13 }
 0x8b8   : > { %v588_v26 = vsel %vm454_vm13, %v587_v35, %v584_v36 }
 0x8b9   : > { %591 = vst.msk [vmem:[#allocation3] sm:$0xf] %vm589_vm2, %v588_v26  ;;  %v637_v37 = vmul.f32 %v636_v34, %v588_v26  ;;  %v653_v40 = vmul.f32 %v652_v39, %v588_v26  ;;  %v645_v44 = vmul.f32 %v644_v41, %v588_v26  ;;  %v661_v46 = vmul.f32 %v660_v45, %v588_v26 }
 0x8ba   : > { %v633_v60 = vmul.f32 %v632_v56, %v588_v26 }
 0x8bb   : > { %619 = vrot.lane.b32.xlu1 %v617_v6, %s1060_s25  ;;  %639 = vrot.lane.b32.xlu0 %v637_v37, %s1059_s13  ;;  %s962_s13 = scalar_lea.vmem %s1409_s12, 16 }
 0x8bc   : > { %p963_p12 = scmp.ne.s32.totalorder %s1409_s12, %s962_s13 }
 0x8be   : > { %p964_p13 = pnand %p963_p12, %p1476_p2 }
 0x8bf   : > { %627 = vrot.lane.b32.xlu1 %v625_v55, %s1061_s29  ;;  %655 = vrot.lane.b32.xlu0 %v653_v40, %s1060_s25  ;;  %s968_s25 = scalar_lea.vmem %s967_s22, 32 }
 0x8c0   : > { %p965_p6 = pneg %p964_p13  ;;  %p970_p1 = scmp.lt.s32.totalorder %s968_s25, %s962_s13 }
 0x8c2   : > { %p971_p9 = por %p970_p1, %p969_p0 }
 0x8c3   : > { %647 = vrot.lane.b32.xlu1 %v645_v44, %s1058_s21  ;;  %674 = vbcast.lane.b32.xlu0 %v813_v42, 256  ;;  %s690_s21 = scalar_lea.sflag [#allocation6], %s1234_s14 }
 0x8c4   : > { %p972_p8 = pnand %p971_p9, %p965_p6 }
 0x8c7   : > { %663 = vrot.lane.b32.xlu1 %v661_v46, %s1061_s29 }
 0x929   : > { %v612_v49 = vpop.permute.xlu1 %611  ;;  %v604_v51 = vpop.permute.xlu0 %603 }
 0x92a   : > { %v606_v52 = vadd.f32 %v604_v51, %v597_v48 }
 0x92c   : > { %v614_v53 = vadd.f32 %v612_v49, %v606_v52 }
 0x92d   : > { %v620_v54 = vpop.permute.xlu1 %619  ;;  %v640_v58 = vpop.permute.xlu0 %639 }
 0x92e   : > { %v622_v57 = vadd.f32 %v620_v54, %v614_v53 }
 0x931   : > { %v628_v59 = vpop.permute.xlu1 %627  ;;  %v656_v2 = vpop.permute.xlu0 %655 }
 0x932   : > { %v630_v61 = vadd.f32 %v628_v59, %v622_v57 }
 0x934   : > { %v634_v62 = vadd.f32 %v633_v60, %v630_v61 }
 0x935   : > { %v648_v63 = vpop.permute.xlu1 %647  ;;  %v675_v7 = vpop.permute.xlu0 %674 }
 0x936   : > { %v642_v0 = vadd.f32 %v640_v58, %v634_v62 }
 0x938   : > { %v650_v3 = vadd.f32 %v648_v63, %v642_v0 }
 0x939   : > { %v664_v5 = vpop.permute.xlu1 %663 }
 0x93a   : > { %v658_v4 = vadd.f32 %v656_v2, %v650_v3 }
 0x93c   : > { %v666_v8 = vadd.f32 %v664_v5, %v658_v4 }
 0x93e   : > { %v677_v9 = vadd.f32 %v675_v7, %v666_v8 }
 0x940   : > { %680 = vperm.xlu1 %913, %v677_v9  }
 0x9bf   : > { %v681_v12 = vpop.permute.xlu1 %680 }
 0x9c0   : > { %v685_v13 = vrot.slane %v681_v12, %v684_v11 }
 0x9c2   : > { %688 = vst.msk [vmem:[%s243_s30] sm:$0x1] %vm687_vm3, %v685_v13 }
 0x9c3   : > { %975 = shalt.err (!%p972_p8)
}
 0x9c4   : > { %s976_s14 = scalar_lea.hbm %s1407_s8, 16  ;;  %s980_s6 = scalar_lea.hbm %s1460_s4, 32 }
 0x9c5   : > { %p977_p4 = scmp.ne.s32.totalorder %s1407_s8, %s976_s14  ;;  %p981_p5 = scmp.lt.u32.totalorder %s1407_s8, %s1460_s4 }
 0x9c6   : > { %p982_p3 = scmp.lt.u32.totalorder %s980_s6, %s976_s14  ;;  %p984_p12 = scmp.lt.u32.totalorder %s976_s14, %s1407_s8 }
 0x9c7   : > { %p978_p10 = pnand %p977_p4, %p1476_p2 }
 0x9c8   : > { %p983_p7 = por %p982_p3, %p981_p5 }
 0x9c9   : > { %p979_p11 = pneg %p978_p10 }
 0x9ca   : > { %p985_p13 = por %p984_p12, %p983_p7 }
 0x9cc   : > { %p986_p6 = pnand %p985_p13, %p979_p11 }
 0x9ce   : > { %989 = shalt.err (!%p986_p6)
}
 0x9cf   : > { %835 = dma.vmem_to_hbm [thread:$0]  (%p1476_p2), %s1409_s12, 16, %s1407_s8, %s690_s21  }
 0x9d0 PF: > { %s714_s26 = sand.u32 1, %s1028_s15   ;;  %p1477_p0 = scmp.ne.s32.totalorder %s1469_s28, 0 }
 0x9d1   : > { %p1478_p1 = scmp.ge.s32.totalorder %s1048_s20, 2  ;;  %s715_s30 = scalar_lea.sflag [#allocation6], %s714_s26 }
 0x9d3   : > { %p846_p9 = pnand %p1478_p1, %p1477_p0 }
 0x9d5   : > { %1023 = dma.done.wait (!%p846_p9), %s715_s30, 16  }
 0x9d6   : > { %1025 = vsyncadd (!%p846_p9), %s715_s30, 4294967280  ;;  %s21_s20 = sadd.s32 1, %s1048_s20   ;;  %s1479_s15 = smov %s1032_s16 }
 0x9d7   : > { %p18_p8 = scmp.ge.s32.totalorder %s21_s20, 4   ;;  %s1480_s16 = smov %s1036_s17 }
 0x9d8   : > { %s1481_s17 = smov %s1199_s5  ;;  %s1482_s18 = smov %s1044_s19 }
 0x9d9   : > { %s1483_s19 = smov %s1485_s9  ;;  %20 = sbr.rel (!%p18_p8) target bundleno = 7 (0x7), region = 94 }
 0x9e0   :  { %719 = vsyncpa [#allocation5], 1 }
 0x9e1   :  { %721 = vsyncpa [#allocation5 + $0x1], 1 }
 0x9e2   :  { %722 = vsyncpa [#allocation6], 1 }
 0x9e3   :  { %724 = vsyncpa [#allocation6 + $0x1], 1 }
 0x9e4   :  { %725 = vsyncpa [#allocation7], 1 }
 0x9e5   :  { %727 = vsyncpa [#allocation7 + $0x1], 1 }

</bundles_post_ra>
